<compile_context>
chip_gen: v7x
topology: tpu7x:2x2x1
jax: 0.10.0
libtpu: 0.0.40
codegen_flags: <defaults>
</compile_context>

<pallas_src>
import functools

import jax
import jax.numpy as jnp
from jax.experimental import pallas as pl
from jax.experimental.pallas import tpu as pltpu


def _round_up(x, m):
    return ((x + m - 1) // m) * m


def _attention_kernel(x_ref, w1_ref, b1_ref, w2_ref, h_ref, beta_ref, *, mm_dtype):
    # x_ref   : [M, D, TILE_N]  stacked metapath outputs, node tile on lanes
    # w1_ref  : [M, A, D]       fc1 weight, pre-broadcast over M (tiny), mm_dtype
    # b1_ref  : [A, 1]          fc1 bias  (f32, column layout)
    # w2_ref  : [A, 1]          fc2 weight (f32, column layout)
    # h_ref   : [D, TILE_N]     fused output tile (input dtype)
    # beta_ref: [M, TILE_N]     attention weights tile (float32)
    num_meta = x_ref.shape[0]

    x = x_ref[...]                                   # stays in the input dtype
    w1 = w1_ref[...]                                 # already mm_dtype
    b1 = b1_ref[...].astype(jnp.float32)             # [A, 1]
    w2 = w2_ref[...].astype(jnp.float32)             # [A, 1]

    # --- fc1: one batched MXU matmul over the M metapaths --------------------
    # Contraction over D; lane dim of every operand/result is the node tile,
    # so loads/stores are full-lane and tanh acts only on useful elements.
    # bf16 MXU inputs, f32 accumulation (cast happens only at the matmul input).
    hid = jnp.einsum("mad,mdn->man", w1, x.astype(mm_dtype),
                     preferred_element_type=jnp.float32)          # [M, A, Tn] f32
    hid = jnp.tanh(hid + b1)                                      # b1 broadcasts over lanes

    # --- fc2 (width-1 output): VPU multiply + A-axis (sublane) reduce --------
    # Unrolled over the small static M so every op is a plain 2D op; scores
    # land directly in the lane-dense [1, TILE_N] layout the softmax wants.
    scores = [jnp.sum(hid[m] * w2, axis=0, keepdims=True)         # [1, Tn]
              for m in range(num_meta)]

    # --- softmax over the metapath axis (exact normalization) ----------------
    s_max = scores[0]
    for m in range(1, num_meta):
        s_max = jnp.maximum(s_max, scores[m])
    exps = [jnp.exp(s - s_max) for s in scores]
    denom = exps[0]
    for m in range(1, num_meta):
        denom = denom + exps[m]
    inv_denom = 1.0 / denom        # exact divide: denom is only [1, TILE_N]

    # --- beta rows + weighted sum of the metapath outputs --------------------
    h_acc = None
    for m in range(num_meta):
        beta_m = exps[m] * inv_denom                               # [1, Tn] f32
        beta_ref[m:m + 1, :] = beta_m
        contrib = beta_m * x[m].astype(jnp.float32)                # sublane broadcast over D
        h_acc = contrib if h_acc is None else h_acc + contrib
    h_ref[...] = h_acc.astype(h_ref.dtype)                         # lane-dense [D, Tn] store


def attention_forward(metapath_outs, w1, b1, w2, *, tile_n=None,
                      fc1_in_bf16=True, interpret=False):
    """Inter-metapath attention forward.

    metapath_outs: [M, N, in_dim] (or list/tuple of M [N, in_dim] arrays)
    w1: [attn_vec_dim, in_dim]  (fc1.weight, PyTorch layout)
    b1: [attn_vec_dim]          (fc1.bias)
    w2: [1, attn_vec_dim]       (fc2.weight)
    Returns (h [N, in_dim] in the input dtype, beta [M, N] float32).
    """
    if isinstance(metapath_outs, (list, tuple)):
        metapath_outs = jnp.stack(metapath_outs, axis=0)
    metapath_outs = jnp.asarray(metapath_outs)
    M, N, D = metapath_outs.shape
    A = w1.shape[0]
    out_dtype = metapath_outs.dtype
    mm_dtype = jnp.bfloat16 if fc1_in_bf16 else out_dtype

    # Node-tile size: lane-dense (multiple of 128).  Large tiles amortize the
    # ~0.35us/grid-step overhead; keep >=2 grid steps when N allows so megacore
    # sharding / double-buffering have depth; cap at 4096 so the working set
    # stays far below v7x's 64 MiB VMEM.
    if tile_n is None:
        tile_n = min(4096, max(128, _round_up(pl.cdiv(N, 2), 128)))
    tile_n = min(_round_up(max(int(tile_n), 1), 128), _round_up(N, 128))
    n_pad = _round_up(N, tile_n)
    num_tiles = n_pad // tile_n

    # Lane-dense relayout: node dim last.  (An upstream producer emitting
    # [M, D, N] directly would make this transpose free.)
    x = jnp.transpose(metapath_outs, (0, 2, 1))                    # [M, D, N]
    if n_pad != N:
        x = jnp.pad(x, ((0, 0), (0, 0), (0, n_pad - N)))

    w1_b = jnp.broadcast_to(jnp.asarray(w1).astype(mm_dtype).reshape(1, A, D),
                            (M, A, D))                             # tiny (M*A*D)
    b1_c = jnp.asarray(b1).astype(jnp.float32).reshape(A, 1)
    w2_c = jnp.asarray(w2).astype(jnp.float32).reshape(A, 1)

    kernel = functools.partial(_attention_kernel, mm_dtype=mm_dtype)

    h_t, beta = pl.pallas_call(
        kernel,
        out_shape=(
            jax.ShapeDtypeStruct((D, n_pad), out_dtype),           # h, node dim on lanes
            jax.ShapeDtypeStruct((M, n_pad), jnp.float32),         # beta, always f32
        ),
        grid=(num_tiles,),
        in_specs=[
            # NOTE: if an xprof trace shows exposed DMA, bump this spec to
            # pipeline_mode=pl.Buffered(3); compute per tile is tiny.
            pl.BlockSpec((M, D, tile_n), lambda i: (0, 0, i)),     # x tile
            pl.BlockSpec((M, A, D), lambda i: (0, 0, 0)),          # w1 (VMEM-resident)
            pl.BlockSpec((A, 1), lambda i: (0, 0)),                # b1 (VMEM-resident)
            pl.BlockSpec((A, 1), lambda i: (0, 0)),                # w2 (VMEM-resident)
        ],
        out_specs=(
            pl.BlockSpec((D, tile_n), lambda i: (0, i)),           # h tile (lane-dense)
            pl.BlockSpec((M, tile_n), lambda i: (0, i)),           # beta tile (lane-dense)
        ),
        compiler_params=pltpu.CompilerParams(
            dimension_semantics=("parallel",),
            # 64 MiB: <= v7x physical VMEM; lets v5e/v6e (128 MiB) use big tiles.
            vmem_limit_bytes=64 * 1024 * 1024,
        ),
        interpret=interpret,
    )(x, w1_b, b1_c, w2_c)

    h = jnp.transpose(h_t[:, :N], (1, 0))                          # back to [N, D]
    return h, beta[:, :N]


def _xavier_normal(key, shape, gain):
    fan_out, fan_in = shape
    std = gain * jnp.sqrt(2.0 / (fan_in + fan_out))
    return std * jax.random.normal(key, shape, dtype=jnp.float32)


def _reference(x, w1, b1, w2, *, fc1_in_bf16=True):
    # Pure-JAX reference mirroring the PyTorch forward; fc1 matmul inputs are
    # cast to the same precision the kernel uses so the check below is tight.
    mm = jnp.bfloat16 if fc1_in_bf16 else x.dtype
    hid = jnp.tanh(
        jnp.einsum("mnd,ad->mna", x.astype(mm), w1.astype(mm),
                   preferred_element_type=jnp.float32)
        + b1.astype(jnp.float32))                                  # [M, N, A] f32
    s = jnp.einsum("mna,oa->mno", hid, w2.astype(jnp.float32))     # [M, N, 1]
    beta = jax.nn.softmax(s, axis=0)                               # [M, N, 1] f32
    h = jnp.sum(beta * x.astype(jnp.float32), axis=0)              # [N, D]
    return h.astype(x.dtype), beta[..., 0]


if __name__ == "__main__":
    # Small, deterministic shapes; N deliberately not a multiple of the tile so
    # the padding + multi-tile grid path is exercised.
    M, N = 3, 300          # number of metapaths, number of nodes
    in_dim, attn_vec_dim = 32, 16
    TILE_N = 128

    key = jax.random.PRNGKey(0)
    k_x, k_w1, k_b1, k_w2 = jax.random.split(key, 4)

    metapath_outs = jax.random.normal(k_x, (M, N, in_dim), dtype=jnp.float32)
    w1 = _xavier_normal(k_w1, (attn_vec_dim, in_dim), gain=1.414)            # fc1.weight [A, D]
    b1 = 0.01 * jax.random.normal(k_b1, (attn_vec_dim,), dtype=jnp.float32)  # fc1.bias [A]
    w2 = _xavier_normal(k_w2, (1, attn_vec_dim), gain=1.414)                 # fc2.weight [1, A]

    h, beta = attention_forward(metapath_outs, w1, b1, w2, tile_n=TILE_N)
    jax.block_until_ready((h, beta))

    h_ref, beta_ref = _reference(metapath_outs, w1, b1, w2, fc1_in_bf16=True)

    assert h.shape == (N, in_dim) and beta.shape == (M, N)
    assert jnp.allclose(h, h_ref, atol=2e-3, rtol=2e-3)
    assert jnp.allclose(beta, beta_ref, atol=2e-3, rtol=2e-3)
    # exact softmax normalization: beta columns sum to 1
    assert jnp.allclose(jnp.sum(beta, axis=0), jnp.ones((N,)), atol=1e-3)
    assert bool(jnp.all(beta >= 0.0)) and bool(jnp.all(beta <= 1.0))

    print("KERNEL_OK")
</pallas_src>

<mosaic_0001>
module attributes {stable_mosaic.version = 11 : i64} {
  func.func @_attention_kernel(%arg0: i32, %arg1: memref<3x32x128xf32, #tpu.memory_space<vmem>>, %arg2: memref<3x16x32xbf16, #tpu.memory_space<vmem>>, %arg3: memref<16x1xf32, #tpu.memory_space<vmem>>, %arg4: memref<16x1xf32, #tpu.memory_space<vmem>>, %arg5: memref<32x128xf32, #tpu.memory_space<vmem>>, %arg6: memref<3x128xf32, #tpu.memory_space<vmem>>) attributes {dimension_semantics = [#tpu.dimension_semantics<parallel>], iteration_bounds = array<i64: 3>, scalar_prefetch = 0 : i64, scratch_operands = 0 : i64, tpu.core_type = #tpu.core_type<tc>, window_params = [{transform_indices = @transform_0, window_bounds = array<i64: 3, 32, 128>}, {pipeline_mode = #tpu.pipeline_mode<synchronous>, transform_indices = @transform_1, window_bounds = array<i64: 3, 16, 32>}, {pipeline_mode = #tpu.pipeline_mode<synchronous>, transform_indices = @transform_2, window_bounds = array<i64: 16, 1>}, {pipeline_mode = #tpu.pipeline_mode<synchronous>, transform_indices = @transform_3, window_bounds = array<i64: 16, 1>}, {transform_indices = @transform_4, window_bounds = array<i64: 32, 128>}, {transform_indices = @transform_5, window_bounds = array<i64: 3, 128>}]} {
    %c0 = arith.constant 0 : index
    %c0_0 = arith.constant 0 : index
    %c0_1 = arith.constant 0 : index
    %0 = vector.load %arg1[%c0, %c0_0, %c0_1] : memref<3x32x128xf32, #tpu.memory_space<vmem>>, vector<3x32x128xf32>
    %c0_2 = arith.constant 0 : index
    %c0_3 = arith.constant 0 : index
    %c0_4 = arith.constant 0 : index
    %1 = vector.load %arg2[%c0_2, %c0_3, %c0_4] : memref<3x16x32xbf16, #tpu.memory_space<vmem>>, vector<3x16x32xbf16>
    %c0_5 = arith.constant 0 : index
    %c0_6 = arith.constant 0 : index
    %2 = vector.load %arg3[%c0_5, %c0_6] : memref<16x1xf32, #tpu.memory_space<vmem>>, vector<16x1xf32>
    %c0_7 = arith.constant 0 : index
    %c0_8 = arith.constant 0 : index
    %3 = vector.load %arg4[%c0_7, %c0_8] : memref<16x1xf32, #tpu.memory_space<vmem>>, vector<16x1xf32>
    %4 = arith.truncf %0 : vector<3x32x128xf32> to vector<3x32x128xbf16>
    "tpu.trace_start"() <{level = 10 : i32, message = "mad,mdn->man"}> : () -> ()
    %cst = arith.constant dense<0.000000e+00> : vector<3x16x128xf32>
    %5 = tpu.matmul %1, %4, %cst {dimension_numbers = #tpu.dot_dimension_numbers<[2], [1], [1], [2], [0, 0, 0, 1, 1, 2], [0], [0]>} : vector<3x16x32xbf16>, vector<3x32x128xbf16>, vector<3x16x128xf32> -> vector<3x16x128xf32>
    "tpu.trace_stop"() : () -> ()
    %6 = vector.shape_cast %2 : vector<16x1xf32> to vector<1x16x1xf32>
    %7 = vector.broadcast %6 : vector<1x16x1xf32> to vector<3x16x128xf32>
    %8 = arith.addf %5, %7 : vector<3x16x128xf32>
    %9 = math.tanh %8 : vector<3x16x128xf32>
    %10 = vector.extract_strided_slice %9 {offsets = [0, 0, 0], sizes = [1, 16, 128], strides = [1, 1, 1]} : vector<3x16x128xf32> to vector<1x16x128xf32>
    %11 = vector.shape_cast %10 : vector<1x16x128xf32> to vector<16x128xf32>
    %12 = vector.broadcast %3 : vector<16x1xf32> to vector<16x128xf32>
    %13 = arith.mulf %11, %12 : vector<16x128xf32>
    %cst_9 = arith.constant dense<0.000000e+00> : vector<128xf32>
    %14 = vector.multi_reduction <add>, %13, %cst_9 [0] : vector<16x128xf32> to vector<128xf32>
    %15 = vector.shape_cast %14 : vector<128xf32> to vector<1x128xf32>
    %16 = vector.extract_strided_slice %9 {offsets = [1, 0, 0], sizes = [1, 16, 128], strides = [1, 1, 1]} : vector<3x16x128xf32> to vector<1x16x128xf32>
    %17 = vector.shape_cast %16 : vector<1x16x128xf32> to vector<16x128xf32>
    %18 = vector.broadcast %3 : vector<16x1xf32> to vector<16x128xf32>
    %19 = arith.mulf %17, %18 : vector<16x128xf32>
    %cst_10 = arith.constant dense<0.000000e+00> : vector<128xf32>
    %20 = vector.multi_reduction <add>, %19, %cst_10 [0] : vector<16x128xf32> to vector<128xf32>
    %21 = vector.shape_cast %20 : vector<128xf32> to vector<1x128xf32>
    %22 = vector.extract_strided_slice %9 {offsets = [2, 0, 0], sizes = [1, 16, 128], strides = [1, 1, 1]} : vector<3x16x128xf32> to vector<1x16x128xf32>
    %23 = vector.shape_cast %22 : vector<1x16x128xf32> to vector<16x128xf32>
    %24 = vector.broadcast %3 : vector<16x1xf32> to vector<16x128xf32>
    %25 = arith.mulf %23, %24 : vector<16x128xf32>
    %cst_11 = arith.constant dense<0.000000e+00> : vector<128xf32>
    %26 = vector.multi_reduction <add>, %25, %cst_11 [0] : vector<16x128xf32> to vector<128xf32>
    %27 = vector.shape_cast %26 : vector<128xf32> to vector<1x128xf32>
    %28 = arith.maximumf %15, %21 : vector<1x128xf32>
    %29 = arith.maximumf %28, %27 : vector<1x128xf32>
    %30 = arith.subf %15, %29 : vector<1x128xf32>
    %31 = math.exp %30 : vector<1x128xf32>
    %32 = arith.subf %21, %29 : vector<1x128xf32>
    %33 = math.exp %32 : vector<1x128xf32>
    %34 = arith.subf %27, %29 : vector<1x128xf32>
    %35 = math.exp %34 : vector<1x128xf32>
    %36 = arith.addf %31, %33 : vector<1x128xf32>
    %37 = arith.addf %36, %35 : vector<1x128xf32>
    %cst_12 = arith.constant 1.000000e+00 : f32
    %38 = vector.broadcast %cst_12 : f32 to vector<1x128xf32>
    %39 = arith.divf %38, %37 : vector<1x128xf32>
    %40 = arith.mulf %31, %39 : vector<1x128xf32>
    %c0_13 = arith.constant 0 : index
    %c0_14 = arith.constant 0 : index
    %41 = vector.load %arg6[%c0_13, %c0_14] : memref<3x128xf32, #tpu.memory_space<vmem>>, vector<1x128xf32>
    tpu.vector_store %arg6[%c0_13, %c0_14], %40 {strides = array<i32>} : memref<3x128xf32, #tpu.memory_space<vmem>>, vector<1x128xf32>,
    %42 = vector.extract_strided_slice %0 {offsets = [0, 0, 0], sizes = [1, 32, 128], strides = [1, 1, 1]} : vector<3x32x128xf32> to vector<1x32x128xf32>
    %43 = vector.shape_cast %42 : vector<1x32x128xf32> to vector<32x128xf32>
    %44 = vector.broadcast %40 : vector<1x128xf32> to vector<32x128xf32>
    %45 = arith.mulf %44, %43 : vector<32x128xf32>
    %46 = arith.mulf %33, %39 : vector<1x128xf32>
    %c1 = arith.constant 1 : index
    %c0_15 = arith.constant 0 : index
    %47 = vector.load %arg6[%c1, %c0_15] : memref<3x128xf32, #tpu.memory_space<vmem>>, vector<1x128xf32>
    tpu.vector_store %arg6[%c1, %c0_15], %46 {strides = array<i32>} : memref<3x128xf32, #tpu.memory_space<vmem>>, vector<1x128xf32>,
    %48 = vector.extract_strided_slice %0 {offsets = [1, 0, 0], sizes = [1, 32, 128], strides = [1, 1, 1]} : vector<3x32x128xf32> to vector<1x32x128xf32>
    %49 = vector.shape_cast %48 : vector<1x32x128xf32> to vector<32x128xf32>
    %50 = vector.broadcast %46 : vector<1x128xf32> to vector<32x128xf32>
    %51 = arith.mulf %50, %49 : vector<32x128xf32>
    %52 = arith.addf %45, %51 : vector<32x128xf32>
    %53 = arith.mulf %35, %39 : vector<1x128xf32>
    %c2 = arith.constant 2 : index
    %c0_16 = arith.constant 0 : index
    %54 = vector.load %arg6[%c2, %c0_16] : memref<3x128xf32, #tpu.memory_space<vmem>>, vector<1x128xf32>
    tpu.vector_store %arg6[%c2, %c0_16], %53 {strides = array<i32>} : memref<3x128xf32, #tpu.memory_space<vmem>>, vector<1x128xf32>,
    %55 = vector.extract_strided_slice %0 {offsets = [2, 0, 0], sizes = [1, 32, 128], strides = [1, 1, 1]} : vector<3x32x128xf32> to vector<1x32x128xf32>
    %56 = vector.shape_cast %55 : vector<1x32x128xf32> to vector<32x128xf32>
    %57 = vector.broadcast %53 : vector<1x128xf32> to vector<32x128xf32>
    %58 = arith.mulf %57, %56 : vector<32x128xf32>
    %59 = arith.addf %52, %58 : vector<32x128xf32>
    %c0_17 = arith.constant 0 : index
    %c0_18 = arith.constant 0 : index
    %60 = vector.load %arg5[%c0_17, %c0_18] : memref<32x128xf32, #tpu.memory_space<vmem>>, vector<32x128xf32>
    tpu.vector_store %arg5[%c0_17, %c0_18], %59 {strides = array<i32>} : memref<32x128xf32, #tpu.memory_space<vmem>>, vector<32x128xf32>,
    return
  }
  func.func @transform_0(%arg0: i32) -> (i32, i32, i32) {
    %c0_i32 = arith.constant 0 : i32
    %c0_i32_0 = arith.constant 0 : i32
    %c0_i32_1 = arith.constant 0 : i32
    return %c0_i32, %c0_i32_0, %arg0 : i32, i32, i32
  }
  func.func @transform_1(%arg0: i32) -> (i32, i32, i32) {
    %c0_i32 = arith.constant 0 : i32
    %c0_i32_0 = arith.constant 0 : i32
    %c0_i32_1 = arith.constant 0 : i32
    %c0_i32_2 = arith.constant 0 : i32
    return %c0_i32, %c0_i32_0, %c0_i32_1 : i32, i32, i32
  }
  func.func @transform_2(%arg0: i32) -> (i32, i32) {
    %c0_i32 = arith.constant 0 : i32
    %c0_i32_0 = arith.constant 0 : i32
    %c0_i32_1 = arith.constant 0 : i32
    return %c0_i32, %c0_i32_0 : i32, i32
  }
  func.func @transform_3(%arg0: i32) -> (i32, i32) {
    %c0_i32 = arith.constant 0 : i32
    %c0_i32_0 = arith.constant 0 : i32
    %c0_i32_1 = arith.constant 0 : i32
    return %c0_i32, %c0_i32_0 : i32, i32
  }
  func.func @transform_4(%arg0: i32) -> (i32, i32) {
    %c0_i32 = arith.constant 0 : i32
    %c0_i32_0 = arith.constant 0 : i32
    return %c0_i32, %arg0 : i32, i32
  }
  func.func @transform_5(%arg0: i32) -> (i32, i32) {
    %c0_i32 = arith.constant 0 : i32
    %c0_i32_0 = arith.constant 0 : i32
    return %c0_i32, %arg0 : i32, i32
  }
}

</mosaic_0001>

<bundles_post_ra>
// kernel: tpu_custom_call.1
= control target key start
LH: loop header
LB: loop body
LE: loop exit
PB: predicated region body
PF: predicated region fallthrough
CT: control target
= control target key end

     0   :  { %s1549_s0 = inlined_call_operand.hbm [shape: f32[3,32,384], index: 0, kind: input, shape index: {}]   ;;  %s1550_s1 = inlined_call_operand.hbm [shape: bf16[3,16,32], index: 1, kind: input, shape index: {}]   ;;  %s1551_s2 = inlined_call_operand.hbm [shape: f32[16,1], index: 2, kind: input, shape index: {}]   ;;  %s1552_s3 = inlined_call_operand.hbm [shape: f32[16,1], index: 3, kind: input, shape index: {}]   ;;  %s1553_s4 = inlined_call_operand.hbm [shape: f32[32,384], index: 4, kind: output, shape index: {0}]   ;;  %s1554_s5 = inlined_call_operand.hbm [shape: f32[3,384], index: 5, kind: output, shape index: {1}]  }
   0x1   :  { %1563 = sst [smem:[#allocation21_spill]] %s1550_s1 }
   0x2   :  { %11 = vsyncpa [#allocation3], 0 }
   0x3   :  { %13 = vsyncpa [#allocation3 + $0x1], 0 }
   0x4   :  { %14 = vsyncpa [#allocation6], 0 }
   0x5   :  { %15 = vsyncpa [#allocation9], 0 }
   0x6   :  { %16 = vsyncpa [#allocation4], 0 }
   0x7   :  { %18 = vsyncpa [#allocation4 + $0x1], 0 }
   0x8   :  { %19 = vsyncpa [#allocation12], 0 }
   0x9   :  { %21 = vsyncpa [#allocation12 + $0x1], 0  ;;  %s1184_s18 = smov 0   ;;  %s1186_s19 = smov 0  }
   0xa   :  { %s1188_s20 = smov 0   ;;  %s1190_s21 = smov 0  }
   0xb LB: > { %s1205_s22 = sadd.s32 4294967295, %s1135_s21   ;;  %s737_s23 = sadd.s32 4294967294, %s1135_s21   ;;  %s1135_s21 = sphi %s1190_s21, %s1588_s21   ;;  %s1131_s20 = sphi %s1188_s20, %s1592_s20   ;;  %s1127_s19 = sphi %s1186_s19, %s1591_s19   ;;  %s1123_s18 = sphi %s1184_s18, %s1590_s18  }
   0xc   : > { %s1209_s24 = sadd.s32 1, %s1135_s21   ;;  %s34_s25 = sadd.s32 1, %s1131_s20 }
   0xd   : > { %1564 = sst [smem:[#allocation18_spill]] %s1209_s24  ;;  %s31_s26 = ssub.s32 %s1135_s21, %s1209_s24 }
   0xe   : > { %p41_p0 = scmp.ne.s32.totalorder %s1131_s20, %s1127_s19  ;;  %p32_p1 = scmp.eq.s32.totalorder %s31_s26, 0 }
   0xf   : > { %p42_p2 = scmp.eq.s32.totalorder %s1135_s21, 0  ;;  %p47_p3 = scmp.ne.s32.totalorder %s1127_s19, %s1123_s18 }
  0x10   : > { %p1555_p4 = scmp.eq.s32.totalorder %s1205_s22, 0  ;;  %p134_p7 = scmp.eq.s32.totalorder %s1205_s22, 2 }
  0x11   : > { %s1221_s27 = scalar_select %p32_p1, %s1131_s20, %s34_s25  }
  0x12   : > { %p1223_p5 = por %p42_p2, %p41_p0  ;;  %p1229_p6 = por %p1555_p4, %p47_p3 }
  0x13   : > { %1565 = sst [smem:[#allocation19_spill]] %s1221_s27  ;;  %p140_p8 = scmp.eq.s32.totalorder %s737_s23, 2 }
  0x14   : > { %s1566_s28 = scalar_select %p1223_p5, 1, 0 }
  0x15   : > { %s1567_s29 = scalar_select %p1229_p6, 1, 0 }
  0x16   : > { %p738_p9 = scmp.ge.s32.totalorder %s1135_s21, 1  ;;  %p173_p10 = scmp.lt.s32.totalorder %s1135_s21, 4 }
  0x17   : > { %p1236_p11 = por %p134_p7, %p41_p0  ;;  %p1240_p12 = por %p140_p8, %p47_p3 }
  0x18   : > { %p1244_p13 = pnand %p738_p9, %p173_p10  ;;  %s1137_s8 = smov [#allocation5]  }
  0x19   : > { %s1568_s30 = scalar_select %p1236_p11, 1, 0 }
  0x1a   : > { %s1569_s6 = scalar_select %p1240_p12, 1, 0 }
  0x1b   : > { %s1571_s7 = scalar_select %p1244_p13, 1, 0 }
  0x1c   : > { %1570 = sst [smem:[#allocation20_spill]] %s1569_s6  ;;  %p815_p1 = pneg %p1244_p13 }
  0x1d   : > { %s185_s9 = sshll.u32 %s1137_s8, 4  ;;  %s1138_s11 = smov [#allocation7]   ;;  %s186_s9 = int_to_ptr.vmem [resolvable:$true] %s185_s9 }
  0x1e   : > { %p1252_p2 = pnand %p815_p1, %p1555_p4  ;;  %s198_s12 = sshll.u32 %s1138_s11, 4  ;;  %s199_s12 = int_to_ptr.vmem [resolvable:$true] %s198_s12 }
  0x1f   : > { %s1573_s1 = sld [smem:[#allocation21_spill]] }
  0x20   : > { %p1265_p7 = pneg %p1252_p2 }
  0x25   : > { %s915_s15 = scalar_lea.hbm %s1573_s1, 384 }
  0x26   : > { %p916_p3 = scmp.ne.s32.totalorder %s1573_s1, %s915_s15  ;;  %p922_p10 = scmp.lt.u32.totalorder %s915_s15, %s1573_s1 }
  0x28   : > { %p918_p8 = pnand %p1265_p7, %p916_p3 }
  0x2a   : > { %p919_p9 = pneg %p918_p8 }
  0x2c   : > { %p924_p1 = pnand %p922_p10, %p919_p9 }
  0x2e   : > { %927 = shalt.err (!%p924_p1)
}
  0x2f   : > { %s928_s8 = scalar_lea.vmem %s186_s9, 384  ;;  %p936_p11 = scmp.lt.s32.totalorder %s186_s9, %s186_s9 }
  0x30   : > { %p929_p4 = scmp.ne.s32.totalorder %s186_s9, %s928_s8  ;;  %p937_p6 = scmp.lt.s32.totalorder %s928_s8, %s928_s8 }
  0x32   : > { %p931_p0 = pnand %p929_p4, %p1265_p7  ;;  %p938_p13 = por %p937_p6, %p936_p11 }
  0x34   : > { %p932_p12 = pneg %p931_p0 }
  0x36   : > { %p939_p5 = pnand %p938_p13, %p932_p12 }
  0x38   : > { %942 = shalt.err (!%p939_p5)
}
  0x39   : > { %s1139_s11 = smov 64   ;;  %s1140_s13 = smov 4  }
  0x3a   : > { %818 = dma.hbm_to_vmem [thread:$0]  (!%p1252_p2), %s1573_s1, 384, %s186_s9, [#allocation6], %s1139_s11, %s1139_s11, %s1140_s13  }
  0x3b   : > { %p1575_p3 = scmp.ne.s32.totalorder %s1566_s28, 0  ;;  %p1576_p8 = scmp.lt.s32.totalorder %s1135_s21, 3 }
  0x3c   : > { %s943_s26 = scalar_lea.hbm %s1551_s2, 256 }
  0x3d   : > { %p1285_p4 = pnand %p1576_p8, %p1575_p3  ;;  %p944_p5 = scmp.ne.s32.totalorder %s1551_s2, %s943_s26 }
  0x3e   : > { %p950_p12 = scmp.lt.u32.totalorder %s943_s26, %s1551_s2 }
  0x3f   : > { %s1577_s16 = scalar_select %p1285_p4, 1, 0 }
  0x40   : > { %p946_p6 = pnand %p944_p5, %p1265_p7 }
  0x42   : > { %p947_p11 = pneg %p946_p6 }
  0x44   : > { %p952_p13 = pnand %p950_p12, %p947_p11 }
  0x46   : > { %955 = shalt.err (!%p952_p13)
}
  0x47   : > { %s956_s28 = scalar_lea.vmem %s199_s12, 256  ;;  %p964_p1 = scmp.lt.s32.totalorder %s199_s12, %s199_s12 }
  0x48   : > { %p957_p0 = scmp.ne.s32.totalorder %s199_s12, %s956_s28  ;;  %p965_p3 = scmp.lt.s32.totalorder %s956_s28, %s956_s28 }
  0x4a   : > { %p959_p9 = pnand %p957_p0, %p1265_p7  ;;  %p966_p8 = por %p965_p3, %p964_p1 }
  0x4c   : > { %p960_p10 = pneg %p959_p9 }
  0x4e   : > { %p967_p4 = pnand %p966_p8, %p960_p10 }
  0x50   : > { %970 = shalt.err (!%p967_p4)
}
  0x51   : > { %s1141_s27 = smov 128   ;;  %s1142_s11 = smov 8  }
  0x52   : > { %821 = dma.hbm_to_vmem [thread:$0]  (!%p1252_p2), %s1551_s2, 256, %s199_s12, [#allocation6], %s1141_s27, %s1141_s27, %s1142_s11  }
  0x53   : > { %s1143_s17 = smov [#allocation8]   ;;  %s225_s26 = sand.u32 1, %s1131_s20  }
  0x54   : > { %s211_s25 = sshll.u32 %s1143_s17, 4  ;;  %s971_s9 = scalar_lea.hbm %s1552_s3, 256  ;;  %s212_s25 = int_to_ptr.vmem [resolvable:$true] %s211_s25 }
  0x55   : > { %p972_p4 = scmp.ne.s32.totalorder %s1552_s3, %s971_s9  ;;  %p978_p11 = scmp.lt.u32.totalorder %s971_s9, %s1552_s3 }
  0x57   : > { %p974_p5 = pnand %p972_p4, %p1265_p7 }
  0x59   : > { %p975_p6 = pneg %p974_p5 }
  0x5b   : > { %p980_p12 = pnand %p978_p11, %p975_p6 }
  0x5d   : > { %983 = shalt.err (!%p980_p12)
}
  0x5e   : > { %s984_s12 = scalar_lea.vmem %s212_s25, 256  ;;  %p992_p10 = scmp.lt.s32.totalorder %s212_s25, %s212_s25 }
  0x5f   : > { %p985_p13 = scmp.ne.s32.totalorder %s212_s25, %s984_s12  ;;  %p993_p1 = scmp.lt.s32.totalorder %s984_s12, %s984_s12 }
  0x61   : > { %p987_p0 = pnand %p985_p13, %p1265_p7  ;;  %p994_p3 = por %p993_p1, %p992_p10 }
  0x63   : > { %p988_p9 = pneg %p987_p0 }
  0x65   : > { %p995_p8 = pnand %p994_p3, %p988_p9 }
  0x67   : > { %998 = shalt.err (!%p995_p8)
}
  0x68   : > { %824 = dma.hbm_to_vmem [thread:$0]  (!%p1252_p2), %s1552_s3, 256, %s212_s25, [#allocation9], %s1141_s27, %s1141_s27, %s1142_s11  }
  0x69   : > { %s795_s6 = smul.u32 96, %s225_s26  ;;  %s743_s23 = sshll.u32 %s1135_s21, 7 }
  0x6a   : > { %s1336_s17 = scalar_lea.hbm %s1549_s0, %s743_s23  ;;  %s1340_s14 = scalar_lea.sflag [#allocation3], %s225_s26 }
  0x6b   : > { %s229_s10 = scalar_lea.vmem [#allocation2], %s795_s6  ;;  %s999_s9 = scalar_lea.hbm %s1336_s17, 1536 }
  0x6c   : > { %s235_s8 = sshll.u32 %s229_s10, 4  ;;  %p1000_p7 = scmp.ne.s32.totalorder %s1336_s17, %s999_s9  ;;  %s1338_s8 = int_to_ptr.vmem [resolvable:$true] %s235_s8 }
  0x6d   : > { %p1578_p2 = scmp.ne.s32.totalorder %s1577_s16, 0  ;;  %s1004_s12 = scalar_lea.hbm %s1549_s0, 4608 }
  0x6e   : > { %p1005_p11 = scmp.lt.u32.totalorder %s1336_s17, %s1549_s0  ;;  %p1006_p12 = scmp.lt.u32.totalorder %s1004_s12, %s999_s9 }
  0x6f   : > { %p1001_p4 = pneg %p1578_p2  ;;  %p1008_p0 = scmp.lt.u32.totalorder %s999_s9, %s1336_s17 }
  0x70   : > { %p1007_p13 = por %p1006_p12, %p1005_p11 }
  0x71   : > { %p1002_p5 = pnand %p1001_p4, %p1000_p7 }
  0x72   : > { %p1009_p9 = por %p1008_p0, %p1007_p13 }
  0x73   : > { %p1003_p6 = pneg %p1002_p5 }
  0x75   : > { %p1010_p10 = pnand %p1009_p9, %p1003_p6 }
  0x77   : > { %1013 = shalt.err (!%p1010_p10)
}
  0x78   : > { %s1014_s26 = scalar_lea.vmem %s1338_s8, 1536  ;;  %s1144_s6 = smov [#allocation2]  }
  0x79   : > { %p1015_p1 = scmp.ne.s32.totalorder %s1338_s8, %s1014_s26  ;;  %s1019_s23 = sshll.u32 %s1144_s6, 4  ;;  %s1020_s23 = int_to_ptr.vmem [resolvable:$false] %s1019_s23 }
  0x7a   : > { %s1021_s13 = scalar_lea.vmem %s1020_s23, 3072  ;;  %p1022_p7 = scmp.lt.s32.totalorder %s1338_s8, %s1020_s23 }
  0x7b   : > { %p1017_p3 = pnand %p1015_p1, %p1001_p4  ;;  %p1023_p5 = scmp.lt.s32.totalorder %s1021_s13, %s1014_s26 }
  0x7d   : > { %p1018_p8 = pneg %p1017_p3  ;;  %p1024_p11 = por %p1023_p5, %p1022_p7 }
  0x7f   : > { %p1025_p12 = pnand %p1024_p11, %p1018_p8 }
  0x81   : > { %1028 = shalt.err (!%p1025_p12)
}
  0x82   : > { %s1145_s15 = smov 384   ;;  %p1579_p4 = scmp.ne.s32.totalorder %s1571_s7, 0 }
  0x83   : > { %828 = dma.hbm_to_vmem [thread:$0]  (!%p1578_p2), %s1336_s17, 1536, %s1338_s8, %s1340_s14, %s1145_s15, %s1141_s27, %s1142_s11  }
  0x84   : > { %247 = sbr.rel (%p1579_p4) target bundleno = 484 (0x1e4), region = 36  ;;  %s1373_s10 = sand.u32 (!%p1579_p4), 1, %s1127_s19  }
  0x85   : > { %s796_s9 = smul.u32 (!%p1579_p4), 96, %s1373_s10  ;;  %s250_s25 = scalar_lea.sflag (!%p1579_p4), [#allocation3], %s1373_s10 }
  0x86   : > { %p1580_p6 = scmp.ne.s32.totalorder (!%p1579_p4), %s1567_s29, 0 }
  0x87   : > { %s1377_s28 = scalar_lea.vmem (!%p1579_p4), [#allocation2], %s796_s9 }
  0x8b   : > { %1102 = dma.done.wait (%p1580_p6), %s250_s25, 1536  }
  0x8c   : > { %1104 = vsyncadd (%p1580_p6), %s250_s25, 4294965760  ;;  %p1581_p2 = scmp.eq.s32.totalorder %s1205_s22, 0 }
  0x8e   : > { %1106 = dma.done.wait (%p1581_p2), [#allocation6], 640   ;;  %p1582_p13 = pmov %p1581_p2 }
  0x8f   : > { %p1583_p0 = pmov %p1581_p2 }
  0x90   : > { %1108 = vsyncadd (%p1582_p13), [#allocation6], 4294966656 }
  0x91   : > { %1110 = dma.done.wait (%p1583_p0), [#allocation9], 256   ;;  %p1584_p9 = pmov %p1583_p0 }
  0x92   : > { %v1146_v0 = vmov 0.0   ;;  %vm1147_vm0 = vmmov 0   ;;  %v1148_v1 = vmov 0   ;;  %v1394_v2 = vld [vmem:[%s1377_s28] sm:$0xff]  ;;  %v1397_v3 = vld [vmem:[%s1377_s28 + $0x8] sm:$0xff]  ;;  %v1408_v7 = vld [vmem:[%s1377_s28 + $0x10] sm:$0xff] }
  0x93   : > { %1112 = vsyncadd (%p1584_p9), [#allocation9], 4294967040  ;;  %771 = vmatprep.subr.bf16.mxu0 %v1146_v0  ;;  %779 = vmatprep.subr.bf16.mxu1 %v1146_v0  ;;  %v1400_v4 = vld [vmem:[%s1377_s28 + $0x20] sm:$0xff]  ;;  %v320_v5 = vpack.c.bf16 %v1397_v3, %v1394_v2  ;;  %v1405_v6 = vld [vmem:[%s1377_s28 + $0x28] sm:$0xff]  ;;  %vm341_vm1 = vcmask 261120   ;;  %s749_s29 = sshll.u32 %s1373_s10, 2 }
  0x94   : > { %775 = vmatprep.mubr.msk.bf16.mxu0 %vm1147_vm0, %v1146_v0  ;;  %783 = vmatprep.mubr.msk.bf16.mxu1 %vm1147_vm0, %v1146_v0  ;;  %v1411_v8 = vld [vmem:[%s1377_s28 + $0x18] sm:$0xff]  ;;  %v322_v9 = vpack.c.bf16 %v1405_v6, %v1400_v4  ;;  %v1416_v10 = vld [vmem:[%s1377_s28 + $0x30] sm:$0xff]  ;;  %v1426_v14 = vld [vmem:[%s1377_s28 + $0x40] sm:$0xff]  ;;  %s748_s7 = sshll.u32 %s1373_s10, 5  ;;  %s759_s16 = sshll.u32 %s1205_s22, 6 }
  0x95   : > { %890 = vset.pattern.permute.xlu0 %v1148_v1  ;;  %891 = vset.pattern.permute.xlu1 %v1148_v1  ;;  %v1419_v11 = vld [vmem:[%s1377_s28 + $0x38] sm:$0xff]  ;;  %v321_v12 = vpack.c.bf16 %v1411_v8, %v1408_v7  ;;  %v1429_v15 = vld [vmem:[%s1377_s28 + $0x48] sm:$0xff]  ;;  %v892_v16 = vld [vmem:[#allocation5] sm:$0xff]   ;;  %s296_s27 = scalar_lea.vmem [#allocation11], %s749_s29  ;;  %s1451_s14 = scalar_lea.hbm %s1554_s5, %s759_s16 }
  0x96   : > { %772 = vmatpush3.bf16.msra.mxu0 %v320_v5  ;;  %780 = vmatpush3.bf16.msra.mxu1 %v322_v9  ;;  %v323_v13 = vpack.c.bf16 %v1419_v11, %v1416_v10  ;;  %v893_v17 = vld [vmem:[#allocation5 + $0x8] sm:$0xff]   ;;  %v324_v18 = vpack.c.bf16 %v1429_v15, %v1426_v14  ;;  %v316_v19 = vld [vmem:[#allocation7] sm:$0xff]  ;;  %v1434_v21 = vld [vmem:[%s1377_s28 + $0x50] sm:$0xff]  ;;  %s606_s11 = sshll.u32 %s296_s27, 4  ;;  %s758_s12 = sshll.u32 %s1205_s22, 7  ;;  %s1453_s11 = int_to_ptr.vmem [resolvable:$true] %s606_s11 }
  0x97   : > { %773 = vmatprep.subr.bf16.mxu0 %v1146_v0  ;;  %781 = vmatprep.subr.bf16.mxu1 %v1146_v0  ;;  %v318_v20 = vld [vmem:[#allocation8] sm:$0xff]  ;;  %v1437_v22 = vld [vmem:[%s1377_s28 + $0x58] sm:$0xff]  ;;  %v317_v23 = vld [vmem:[#allocation7 + $0x8] sm:$0xff]  ;;  %s1460_s1 = scalar_lea.vmem [#allocation10], %s748_s7  ;;  %s578_s26 = scalar_lea.sflag [#allocation12], %s1373_s10 }
  0x98   : > { %328 = vperm.xlu0 %890, %v316_v19   ;;  %492 = vperm.xlu1 %891, %v318_v20   ;;  %v319_v24 = vld [vmem:[#allocation8 + $0x8] sm:$0xff]  ;;  %v325_v25 = vpack.c.bf16 %v1437_v22, %v1434_v21  ;;  %s590_s24 = sshll.u32 %s1460_s1, 4  ;;  %s1029_s6 = scalar_lea.vmem %s1453_s11, 64  ;;  %s1502_s24 = int_to_ptr.vmem [resolvable:$true] %s590_s24 }
  0x99   : > { %v894_v26 = vld [vmem:[#allocation5 + $0x10] sm:$0xff]   ;;  %p1030_p10 = scmp.ne.s32.totalorder %s1453_s11, %s1029_s6  ;;  %p1585_p1 = scmp.ne.s32.totalorder %s1568_s30, 0 }
  0x9a   : > { %774 = vmatpush3.bf16.msra.mxu0 %v321_v12  ;;  %782 = vmatpush3.bf16.msra.mxu1 %v323_v13  ;;  %s1149_s23 = smov [#allocation11]  }
  0x9b   : > { %787 = vmatprep.subr.bf16.mxu0 %v1146_v0  ;;  %p1031_p3 = pnand %p1030_p10, %p1585_p1  ;;  %s1033_s13 = sshll.u32 %s1149_s23, 4  ;;  %s1034_s13 = int_to_ptr.vmem [resolvable:$false] %s1033_s13 }
  0x9c   : > { %333 = vperm.xlu0 %890, %v317_v23   ;;  %497 = vperm.xlu1 %891, %v319_v24   ;;  %s1035_s15 = scalar_lea.vmem %s1034_s13, 128  ;;  %p1036_p7 = scmp.lt.s32.totalorder %s1453_s11, %s1034_s13 }
  0x9d   : > { %776 = vmatmul.mubr.msk.bf16.vlgmr.msra.gmra.mrb[0].mxu0 %vm341_vm1, %v892_v16  ;;  %784 = vmatmul.mubr.msk.bf16.vlgmr.msra.gmra.mrb[0].mxu1 %vm341_vm1, %v893_v17  ;;  %p1032_p8 = pneg %p1031_p3  ;;  %p1037_p5 = scmp.lt.s32.totalorder %s1035_s15, %s1029_s6 }
  0x9e   : > { %788 = vmatpush3.bf16.msra.mxu0 %v324_v18  ;;  %791 = vmatprep.mubr.msk.bf16.mxu0 %vm1147_vm0, %v1146_v0 }
  0x9f   : > { %789 = vmatprep.subr.bf16.mxu0 %v1146_v0  ;;  %p1038_p11 = por %p1037_p5, %p1036_p7 }
  0xa1   : > { %p1039_p12 = pnand %p1038_p11, %p1032_p8 }
  0xa2   : > { %790 = vmatpush3.bf16.msra.mxu0 %v325_v25 }
  0xa5   : > { %792 = vmatmul.mubr.msk.bf16.vlgmr.msra.gmra.mrb[4].mxu0 %vm341_vm1, %v894_v26 }
 0x117   : > { %v329_v27 = vpop.permute.xlu0 %328  ;;  %v493_v41 = vpop.permute.xlu1 %492 }
 0x11b   : > { %v334_v29 = vpop.permute.xlu0 %333  ;;  %v498_v49 = vpop.permute.xlu1 %497 }
 0x170   : > { %v379_v28 = vpop.f32.mrb[0].mxu0  ;;  %v428_v31 = vpop.f32.mrb[0].mxu1 }
 0x171   : > { %v380_v30 = vadd.f32 %v379_v28, %v329_v27  ;;  %v777_v32 = vpop.f32.mrb[1].mxu0  ;;  %v429_v33 = vadd.f32 %v428_v31, %v329_v27  ;;  %v785_v34 = vpop.f32.mrb[1].mxu1 }
 0x172   : > { %v382_v35 = vpop.f32.mrb[2].mxu0  ;;  %v431_v37 = vpop.f32.mrb[2].mxu1 }
 0x173   : > { %895 = vtanh.f32 %v380_v30  ;;  %v383_v36 = vadd.f32 %v382_v35, %v334_v29  ;;  %v778_v38 = vpop.f32.mrb[3].mxu0  ;;  %v432_v39 = vadd.f32 %v431_v37, %v334_v29  ;;  %v786_v40 = vpop.f32.mrb[3].mxu1 }
 0x174   : > { %897 = vtanh.f32 %v429_v33 }
 0x175   : > { %899 = vtanh.f32 %v383_v36 }
 0x176   : > { %901 = vtanh.f32 %v432_v39 }
 0x178   : > { %v477_v42 = vpop.f32.mrb[4].mxu0 }
 0x179   : > { %v478_v43 = vadd.f32 %v477_v42, %v329_v27  ;;  %v793_v44 = vpop.f32.mrb[5].mxu0 }
 0x17a   : > { %v480_v45 = vpop.f32.mrb[6].mxu0 }
 0x17b   : > { %903 = vtanh.f32 %v478_v43  ;;  %v481_v46 = vadd.f32 %v480_v45, %v334_v29  ;;  %v794_v47 = vpop.f32.mrb[7].mxu0 }
 0x17d   : > { %v896_v48 = vpop.eup %895  ;;  %905 = vtanh.f32 %v481_v46 }
 0x17e   : > { %v898_v50 = vpop.eup %897  ;;  %v500_v54 = vmul.f32 %v896_v48, %v493_v41 }
 0x17f   : > { %v900_v51 = vpop.eup %899  ;;  %v509_v52 = vmul.f32 %v898_v50, %v493_v41 }
 0x180   : > { %v902_v53 = vpop.eup %901  ;;  %v501_v55 = vmul.f32 %v900_v51, %v498_v49 }
 0x181   : > { %v510_v56 = vmul.f32 %v902_v53, %v498_v49 }
 0x182   : > { %v502_v57 = vadd.f32 %v501_v55, %v500_v54 }
 0x183   : > { %v511_v58 = vadd.f32 %v510_v56, %v509_v52 }
 0x184   : > { %v503_v59 = vrot.slane %v502_v57, 4 }
 0x185   : > { %v904_v60 = vpop.eup %903  ;;  %v512_v61 = vrot.slane %v511_v58, 4 }
 0x186   : > { %v504_v62 = vadd.f32 %v503_v59, %v502_v57  ;;  %v518_v1 = vmul.f32 %v904_v60, %v493_v41 }
 0x187   : > { %v906_v63 = vpop.eup %905  ;;  %v513_v0 = vadd.f32 %v512_v61, %v511_v58 }
 0x188   : > { %v505_v5 = vrot.slane %v504_v62, 2  ;;  %v519_v9 = vmul.f32 %v906_v63, %v498_v49 }
 0x189   : > { %v514_v12 = vrot.slane %v513_v0, 2 }
 0x18a   : > { %v506_v13 = vadd.f32 %v505_v5, %v504_v62  ;;  %v520_v16 = vadd.f32 %v519_v9, %v518_v1 }
 0x18b   : > { %v515_v17 = vadd.f32 %v514_v12, %v513_v0 }
 0x18c   : > { %v507_v18 = vrot.slane %v506_v13, 1  ;;  %v521_v19 = vrot.slane %v520_v16, 4 }
 0x18d   : > { %v516_v20 = vrot.slane %v515_v17, 1 }
 0x18e   : > { %v508_v23 = vadd.f32 %v507_v18, %v506_v13  ;;  %v522_v24 = vadd.f32 %v521_v19, %v520_v16 }
 0x18f   : > { %v517_v25 = vadd.f32 %v516_v20, %v515_v17 }
 0x190   : > { %v523_v26 = vrot.slane %v522_v24, 2 }
 0x191   : > { %v527_v27 = vmax.f32 %v508_v23, %v517_v25 }
 0x192   : > { %v524_v28 = vadd.f32 %v523_v26, %v522_v24 }
 0x194   : > { %v525_v29 = vrot.slane %v524_v28, 1 }
 0x196   : > { %v526_v30 = vadd.f32 %v525_v29, %v524_v28 }
 0x198   : > { %v528_v31 = vmax.f32 %v527_v27, %v526_v30 }
 0x19a   : > { %v529_v32 = vsub.f32 %v508_v23, %v528_v31  ;;  %v532_v33 = vsub.f32 %v517_v25, %v528_v31  ;;  %v535_v34 = vsub.f32 %v526_v30, %v528_v31 }
 0x19c   : > { %v530_v35 = vmul.f32 1.442695, %v529_v32  ;;  %v533_v36 = vmul.f32 1.442695, %v532_v33  ;;  %v536_v37 = vmul.f32 1.442695, %v535_v34 }
 0x19e   : > { %907 = vpow2.f32 %v530_v35 }
 0x19f   : > { %909 = vpow2.f32 %v533_v36 }
 0x1a0   : > { %911 = vpow2.f32 %v536_v37 }
 0x1a8   : > { %v908_v38 = vpop.eup %907 }
 0x1a9   : > { %v910_v39 = vpop.eup %909 }
 0x1aa   : > { %v538_v40 = vadd.f32 %v910_v39, %v908_v38  ;;  %v912_v41 = vpop.eup %911 }
 0x1ac   : > { %v539_v42 = vadd.f32 %v912_v41, %v538_v40 }
 0x1ae   : > { %913 = vrcp.f32 %v539_v42 }
 0x1b8   : > { %v914_v43 = vpop.eup %913 }
 0x1b9   : > { %v542_v44 = vmul.f32 %v914_v43, %v908_v38  ;;  %v548_v45 = vmul.f32 %v914_v43, %v910_v39  ;;  %v558_v46 = vmul.f32 %v914_v43, %v912_v41 }
 0x1bb   : > { %v544_v47 = vmul.f32 %v542_v44, %v1394_v2  ;;  %v545_v48 = vmul.f32 %v542_v44, %v1397_v3  ;;  %v546_v49 = vmul.f32 %v542_v44, %v1408_v7  ;;  %v547_v50 = vmul.f32 %v542_v44, %v1411_v8  ;;  %543 = vst [vmem:[%s296_s27] sm:$0x1] %v542_v44 }
 0x1bc   : > { %549 = vst [vmem:[%s296_s27 + $0x1] sm:$0x1] %v548_v45  ;;  %559 = vst [vmem:[%s296_s27 + $0x2] sm:$0x1] %v558_v46  ;;  %v550_v51 = vmul.f32 %v548_v45, %v1400_v4  ;;  %v551_v2 = vmul.f32 %v548_v45, %v1405_v6  ;;  %v552_v3 = vmul.f32 %v548_v45, %v1416_v10 }
 0x1bd   : > { %v553_v52 = vmul.f32 %v548_v45, %v1419_v11 }
 0x1be   : > { %1042 = shalt.err (!%p1039_p12)
}
 0x1bf   : > { %s1043_s9 = scalar_lea.hbm %s1451_s14, 64  ;;  %s1047_s29 = scalar_lea.hbm %s1554_s5, 192 }
 0x1c0   : > { %p1044_p4 = scmp.ne.s32.totalorder %s1451_s14, %s1043_s9  ;;  %p1048_p13 = scmp.lt.u32.totalorder %s1451_s14, %s1554_s5 }
 0x1c1   : > { %p1049_p0 = scmp.lt.u32.totalorder %s1047_s29, %s1043_s9  ;;  %p1051_p10 = scmp.lt.u32.totalorder %s1043_s9, %s1451_s14 }
 0x1c2   : > { %p1045_p6 = pnand %p1044_p4, %p1585_p1 }
 0x1c3   : > { %p1050_p9 = por %p1049_p0, %p1048_p13 }
 0x1c4   : > { %p1046_p2 = pneg %p1045_p6 }
 0x1c5   : > { %p1052_p3 = por %p1051_p10, %p1050_p9 }
 0x1c7   : > { %p1053_p8 = pnand %p1052_p3, %p1046_p2 }
 0x1c9   : > { %1056 = shalt.err (!%p1053_p8)
}
 0x1ca   : > { %812 = dma.vmem_to_hbm [thread:$0]  (%p1585_p1), %s1453_s11, 64, %s1451_s14, %s578_s26   ;;  %v560_v4 = vmul.f32 %v558_v46, %v1426_v14  ;;  %v561_v6 = vmul.f32 %v558_v46, %v1429_v15  ;;  %v562_v7 = vmul.f32 %v558_v46, %v1434_v21  ;;  %v563_v8 = vmul.f32 %v558_v46, %v1437_v22 }
 0x1cb   : > { %v554_v10 = vadd.f32 %v550_v51, %v544_v47  ;;  %v555_v11 = vadd.f32 %v551_v2, %v545_v48  ;;  %v556_v53 = vadd.f32 %v552_v3, %v546_v49  ;;  %v557_v54 = vadd.f32 %v553_v52, %v547_v50  ;;  %s1498_s17 = scalar_lea.hbm %s1553_s4, %s758_s12  ;;  %s573_s22 = scalar_lea.sflag [#allocation4], %s1373_s10 }
 0x1cc   : > { %s1057_s8 = scalar_lea.vmem %s1502_s24, 512  ;;  %s1150_s14 = smov [#allocation10]  }
 0x1cd   : > { %v564_v14 = vadd.f32 %v560_v4, %v554_v10  ;;  %v565_v15 = vadd.f32 %v561_v6, %v555_v11  ;;  %v566_v21 = vadd.f32 %v562_v7, %v556_v53  ;;  %v567_v22 = vadd.f32 %v563_v8, %v557_v54  ;;  %p1058_p7 = scmp.ne.s32.totalorder %s1502_s24, %s1057_s8  ;;  %s1061_s12 = sshll.u32 %s1150_s14, 4  ;;  %s1062_s12 = int_to_ptr.vmem [resolvable:$false] %s1061_s12 }
 0x1ce   : > { %s1063_s26 = scalar_lea.vmem %s1062_s12, 1024  ;;  %p1064_p12 = scmp.lt.s32.totalorder %s1502_s24, %s1062_s12 }
 0x1cf   : > { %568 = vst [vmem:[%s1460_s1] sm:$0xff] %v564_v14  ;;  %569 = vst [vmem:[%s1460_s1 + $0x8] sm:$0xff] %v565_v15  ;;  %p1059_p5 = pnand %p1058_p7, %p1585_p1  ;;  %p1065_p4 = scmp.lt.s32.totalorder %s1063_s26, %s1057_s8 }
 0x1d0   : > { %570 = vst [vmem:[%s1460_s1 + $0x10] sm:$0xff] %v566_v21  ;;  %571 = vst [vmem:[%s1460_s1 + $0x18] sm:$0xff] %v567_v22 }
 0x1d1   : > { %p1060_p11 = pneg %p1059_p5  ;;  %p1066_p6 = por %p1065_p4, %p1064_p12 }
 0x1d3   : > { %p1067_p2 = pnand %p1066_p6, %p1060_p11 }
 0x1d5   : > { %1070 = shalt.err (!%p1067_p2)
}
 0x1d6   : > { %s1071_s1 = scalar_lea.hbm %s1498_s17, 512  ;;  %s1075_s13 = scalar_lea.hbm %s1553_s4, 1536 }
 0x1d7   : > { %p1072_p13 = scmp.ne.s32.totalorder %s1498_s17, %s1071_s1  ;;  %p1076_p10 = scmp.lt.u32.totalorder %s1498_s17, %s1553_s4 }
 0x1d8   : > { %p1077_p3 = scmp.lt.u32.totalorder %s1075_s13, %s1071_s1  ;;  %p1079_p7 = scmp.lt.u32.totalorder %s1071_s1, %s1498_s17 }
 0x1d9   : > { %p1073_p0 = pnand %p1072_p13, %p1585_p1 }
 0x1da   : > { %p1078_p8 = por %p1077_p3, %p1076_p10 }
 0x1db   : > { %p1074_p9 = pneg %p1073_p0 }
 0x1dc   : > { %p1080_p5 = por %p1079_p7, %p1078_p8 }
 0x1de   : > { %p1081_p11 = pnand %p1080_p5, %p1074_p9 }
 0x1e0   : > { %1084 = shalt.err (!%p1081_p11)
}
 0x1e1   : > { %s1151_s25 = smov 128   ;;  %s1152_s28 = smov 384  }
 0x1e2   : > { %s1153_s29 = smov 8  }
 0x1e3   : > { %811 = dma.vmem_to_hbm [thread:$0]  (%p1585_p1), %s1502_s24, 512, %s1498_s17, %s573_s22, %s1151_s25, %s1152_s28, %s1153_s29  }
 0x1e4 PF: > { %s1586_s7 = sld [smem:[#allocation20_spill]]  ;;  %p843_p12 = scmp.ge.s32.totalorder %s1135_s21, 2 }
 0x1e5   : > { %s618_s16 = sand.u32 1, %s1123_s18  }
 0x1e6   : > { %s619_s27 = scalar_lea.sflag [#allocation4], %s618_s16 }
 0x1ea   : > { %p1587_p4 = scmp.ne.s32.totalorder %s1586_s7, 0 }
 0x1ec   : > { %p830_p6 = pnand %p843_p12, %p1587_p4 }
 0x1ee   : > { %1114 = dma.done.wait (!%p830_p6), %s619_s27, 512  }
 0x1ef   : > { %1116 = vsyncadd (!%p830_p6), %s619_s27, 4294966784  ;;  %s628_s11 = scalar_lea.sflag [#allocation12], %s618_s16 }
 0x1f0   : > { %1118 = dma.done.wait (!%p830_p6), %s628_s11, 64  }
 0x1f1   : > { %1120 = vsyncadd (!%p830_p6), %s628_s11, 4294967232  ;;  %s1588_s21 = sld [smem:[#allocation18_spill]]  ;;  %s1589_s30 = sld [smem:[#allocation19_spill]] }
 0x1f2   : > { %s1590_s18 = smov %s1127_s19  ;;  %s1591_s19 = smov %s1131_s20 }
 0x1f7   : > { %p24_p1 = scmp.ge.s32.totalorder %s1588_s21, 5   ;;  %s1592_s20 = smov %s1589_s30 }
 0x1f9   :  { %26 = sbr.rel (!%p24_p1) target bundleno = 11 (0xb), region = 110 }
 0x200   :  { %633 = vsyncpa [#allocation3], 1 }
 0x201   :  { %635 = vsyncpa [#allocation3 + $0x1], 1 }
 0x202   :  { %636 = vsyncpa [#allocation6], 1 }
 0x203   :  { %637 = vsyncpa [#allocation9], 1 }
 0x204   :  { %638 = vsyncpa [#allocation4], 1 }
 0x205   :  { %640 = vsyncpa [#allocation4 + $0x1], 1 }
 0x206   :  { %641 = vsyncpa [#allocation12], 1 }
 0x207   :  { %643 = vsyncpa [#allocation12 + $0x1], 1 }

</bundles_post_ra>
